<compile_context>
chip_gen: v7x
topology: tpu7x:2x2x1
jax: 0.10.0
libtpu: 0.0.40
codegen_flags: <defaults>
</compile_context>

<pallas_src>
import functools

import jax
import jax.numpy as jnp
from jax import lax
from jax.experimental import pallas as pl
from jax.experimental.pallas import tpu as pltpu

NUM_CLASSES = 27


def _round_up(x, m):
    return ((x + m - 1) // m) * m


def _label_smoothing_kernel(pred_ref, tgt_ref, out_ref, *,
                            confidence, off_value, n_total, block_cols, ragged):
    # pred_ref: (C, TN) logits (class-major), tgt_ref: (1, TN) int32,
    # out_ref : (1, TN) per-sample losses for this block.
    i = pl.program_id(0)

    x = pred_ref[...].astype(jnp.float32)          # (C, TN) f32 compute
    tgt = tgt_ref[...]                             # (1, TN) int32
    c, tn = x.shape

    # Numerically stable log-sum-exp, reduced over sublanes (axis=0).
    col_max = jnp.max(x, axis=0, keepdims=True)                          # (1, TN)
    lse = jnp.log(jnp.sum(jnp.exp(x - col_max), axis=0, keepdims=True))  # (1, TN)

    # Fused weighted reduce: loss_i = logsumexp_i - sum_c w_c * x[c, i]
    # with w_c = confidence if c == tgt_i else off_value  (sum_c w_c == 1).
    cls_idx = lax.broadcasted_iota(jnp.int32, (c, 1), 0)                 # (C, 1)
    w = jnp.where(cls_idx == tgt, confidence, off_value)                 # (C, TN)
    weighted = jnp.sum(w * x, axis=0, keepdims=True)                     # (1, TN)

    per_col = (col_max + lse) - weighted                                 # (1, TN)

    if ragged:
        last = pl.num_programs(0) - 1

        @pl.when(i == last)
        def _tail():
            col_ids = lax.broadcasted_iota(jnp.int32, (1, tn), 1)
            valid = (i * block_cols + col_ids) < n_total
            # Padded lanes hold stale/unspecified VMEM data (possibly NaN/Inf);
            # the select discards them before anything is written back.
            out_ref[...] = jnp.where(valid, per_col, 0.0)

        @pl.when(i != last)
        def _full():
            out_ref[...] = per_col
    else:
        out_ref[...] = per_col


def label_smoothing_loss(pred, target, num_classes=NUM_CLASSES, smoothing=0.0,
                         *, block_cols=16384):
    """pred: (N, C) float array (f32 or bf16), target: (N,) int array.

    Returns scalar float32 loss.  `block_cols` is the per-grid-step batch tile
    (lanes); the default keeps double-buffered VMEM usage ~4 MiB.
    """
    n, c = pred.shape
    assert c == num_classes
    confidence = 1.0 - smoothing
    off_value = smoothing / (num_classes - 1) if num_classes > 1 else 0.0

    # Class-major layout: lanes = batch, sublanes = classes.
    # TODO(synk): produce the logits class-major upstream to skip this transpose.
    pred_t = pred.T                                   # (C, N)
    tgt2d = target.reshape(1, n).astype(jnp.int32)    # (1, N)

    # Lane tile: multiple of 128, never (much) bigger than the padded batch.
    tn = min(block_cols, _round_up(n, 128))
    tn = _round_up(tn, 128)
    num_blocks = pl.cdiv(n, tn)
    n_padded = num_blocks * tn
    ragged = (n % tn) != 0

    kernel = functools.partial(
        _label_smoothing_kernel,
        confidence=confidence, off_value=off_value,
        n_total=n, block_cols=tn, ragged=ragged,
    )

    per_sample = pl.pallas_call(
        kernel,
        out_shape=jax.ShapeDtypeStruct((1, n_padded), jnp.float32),
        grid_spec=pltpu.PrefetchScalarGridSpec(
            num_scalar_prefetch=0,
            grid=(num_blocks,),
            in_specs=[
                pl.BlockSpec((c, tn), lambda i: (0, i)),   # class-major logits
                pl.BlockSpec((1, tn), lambda i: (0, i)),   # targets
            ],
            out_specs=pl.BlockSpec((1, tn), lambda i: (0, i)),  # lane-dense losses
        ),
        compiler_params=pltpu.CompilerParams(
            dimension_semantics=("parallel",),   # no carried state -> megacore OK
        ),
    )(pred_t, tgt2d)

    # Final mean in plain JAX (tree-reduced; padded tail is zeroed in-kernel).
    return jnp.sum(per_sample) / jnp.float32(n)


def _reference(pred, target, num_classes=NUM_CLASSES, smoothing=0.0):
    confidence = 1.0 - smoothing
    one_hot = jax.nn.one_hot(target, num_classes, dtype=jnp.float32)
    smooth = one_hot * confidence + (1.0 - one_hot) * smoothing / (num_classes - 1)
    logp = jax.nn.log_softmax(pred.astype(jnp.float32), axis=1)
    return jnp.mean(jnp.sum(-smooth * logp, axis=1))


if __name__ == "__main__":
    key = jax.random.PRNGKey(0)
    k1, k2, k3, k4 = jax.random.split(key, 4)

    smoothing = 0.1

    # Case 1: single ragged block (batch < 128).
    batch = 50
    pred = jax.random.normal(k1, (batch, NUM_CLASSES), dtype=jnp.float32)
    target = jax.random.randint(k2, (batch,), 0, NUM_CLASSES, dtype=jnp.int32)
    loss = label_smoothing_loss(pred, target, NUM_CLASSES, smoothing)
    loss = jax.block_until_ready(loss)
    ref = _reference(pred, target, NUM_CLASSES, smoothing)
    assert jnp.allclose(loss, ref, atol=1e-4, rtol=1e-4), (loss, ref)

    # Case 2: no smoothing (pure NLL) on a subset.
    loss0 = label_smoothing_loss(pred[:23], target[:23], NUM_CLASSES, 0.0)
    loss0 = jax.block_until_ready(loss0)
    ref0 = _reference(pred[:23], target[:23], NUM_CLASSES, 0.0)
    assert jnp.allclose(loss0, ref0, atol=1e-4, rtol=1e-4), (loss0, ref0)

    # Case 3: multi-block + ragged tail + bf16 logits (small tile to force
    # several grid steps through the "parallel" grid path).
    batch2 = 300
    pred2 = jax.random.normal(k3, (batch2, NUM_CLASSES), dtype=jnp.bfloat16)
    target2 = jax.random.randint(k4, (batch2,), 0, NUM_CLASSES, dtype=jnp.int32)
    loss2 = label_smoothing_loss(pred2, target2, NUM_CLASSES, smoothing,
                                 block_cols=128)
    loss2 = jax.block_until_ready(loss2)
    ref2 = _reference(pred2, target2, NUM_CLASSES, smoothing)
    assert jnp.allclose(loss2, ref2, atol=2e-2, rtol=2e-2), (loss2, ref2)

    print("KERNEL_OK")
</pallas_src>

<mosaic_0001>
module attributes {stable_mosaic.version = 11 : i64} {
  func.func @_label_smoothing_kernel(%arg0: i32, %arg1: memref<27x128xf32, #tpu.memory_space<vmem>>, %arg2: memref<1x128xi32, #tpu.memory_space<vmem>>, %arg3: memref<1x128xf32, #tpu.memory_space<vmem>>) attributes {dimension_semantics = [#tpu.dimension_semantics<parallel>], iteration_bounds = array<i64: 1>, scalar_prefetch = 0 : i64, scratch_operands = 0 : i64, tpu.core_type = #tpu.core_type<tc>, window_params = [{transform_indices = @transform_0, window_bounds = array<i64: 27, 128>}, {transform_indices = @transform_1, window_bounds = array<i64: 1, 128>}, {transform_indices = @transform_2, window_bounds = array<i64: 1, 128>}]} {
    %c0 = arith.constant 0 : index
    %c0_0 = arith.constant 0 : index
    %0 = vector.load %arg1[%c0, %c0_0] : memref<27x128xf32, #tpu.memory_space<vmem>>, vector<27x128xf32>
    %c0_1 = arith.constant 0 : index
    %c0_2 = arith.constant 0 : index
    %1 = vector.load %arg2[%c0_1, %c0_2] : memref<1x128xi32, #tpu.memory_space<vmem>>, vector<1x128xi32>
    %cst = arith.constant dense<0xFF800000> : vector<128xf32>
    %2 = vector.multi_reduction <maximumf>, %0, %cst [0] : vector<27x128xf32> to vector<128xf32>
    %3 = vector.shape_cast %2 : vector<128xf32> to vector<1x128xf32>
    %4 = vector.broadcast %3 : vector<1x128xf32> to vector<27x128xf32>
    %5 = arith.subf %0, %4 : vector<27x128xf32>
    %6 = math.exp %5 : vector<27x128xf32>
    %cst_3 = arith.constant dense<0.000000e+00> : vector<128xf32>
    %7 = vector.multi_reduction <add>, %6, %cst_3 [0] : vector<27x128xf32> to vector<128xf32>
    %8 = vector.shape_cast %7 : vector<128xf32> to vector<1x128xf32>
    %9 = math.log %8 : vector<1x128xf32>
    %10 = tpu.iota {dimensions = array<i32: 0>} : vector<27x1xi32>
    %11 = vector.broadcast %10 : vector<27x1xi32> to vector<27x128xi32>
    %12 = vector.broadcast %1 : vector<1x128xi32> to vector<27x128xi32>
    %13 = arith.cmpi eq, %11, %12 : vector<27x128xi32>
    %cst_4 = arith.constant 0.899999976 : f32
    %cst_5 = arith.constant 0.00384615385 : f32
    %14 = vector.broadcast %cst_4 : f32 to vector<27x128xf32>
    %15 = vector.broadcast %cst_5 : f32 to vector<27x128xf32>
    %16 = arith.select %13, %14, %15 : vector<27x128xi1>, vector<27x128xf32>
    %17 = arith.mulf %16, %0 : vector<27x128xf32>
    %cst_6 = arith.constant dense<0.000000e+00> : vector<128xf32>
    %18 = vector.multi_reduction <add>, %17, %cst_6 [0] : vector<27x128xf32> to vector<128xf32>
    %19 = vector.shape_cast %18 : vector<128xf32> to vector<1x128xf32>
    %20 = arith.addf %3, %9 : vector<1x128xf32>
    %21 = arith.subf %20, %19 : vector<1x128xf32>
    %c0_i32 = arith.constant 0 : i32
    %22 = arith.cmpi eq, %arg0, %c0_i32 : i32
    %23 = arith.extui %22 : i1 to i32
    %c0_i32_7 = arith.constant 0 : i32
    %24 = arith.cmpi ne, %23, %c0_i32_7 : i32
    scf.if %24 {
      %28 = tpu.iota {dimensions = array<i32: 1>} : vector<1x128xi32>
      %c128_i32 = arith.constant 128 : i32
      %29 = arith.muli %arg0, %c128_i32 : i32
      %30 = vector.broadcast %29 : i32 to vector<1x128xi32>
      %31 = arith.addi %30, %28 : vector<1x128xi32>
      %c50_i32 = arith.constant 50 : i32
      %32 = vector.broadcast %c50_i32 : i32 to vector<1x128xi32>
      %33 = arith.cmpi slt, %31, %32 : vector<1x128xi32>
      %cst_10 = arith.constant 0.000000e+00 : f32
      %34 = vector.broadcast %cst_10 : f32 to vector<1x128xf32>
      %35 = arith.select %33, %21, %34 : vector<1x128xi1>, vector<1x128xf32>
      %c0_11 = arith.constant 0 : index
      %c0_12 = arith.constant 0 : index
      %36 = vector.load %arg3[%c0_11, %c0_12] : memref<1x128xf32, #tpu.memory_space<vmem>>, vector<1x128xf32>
      tpu.vector_store %arg3[%c0_11, %c0_12], %35 {strides = array<i32>} : memref<1x128xf32, #tpu.memory_space<vmem>>, vector<1x128xf32>,
    } else {
    }
    %c0_i32_8 = arith.constant 0 : i32
    %25 = arith.cmpi ne, %arg0, %c0_i32_8 : i32
    %26 = arith.extui %25 : i1 to i32
    %c0_i32_9 = arith.constant 0 : i32
    %27 = arith.cmpi ne, %26, %c0_i32_9 : i32
    scf.if %27 {
      %c0_10 = arith.constant 0 : index
      %c0_11 = arith.constant 0 : index
      %28 = vector.load %arg3[%c0_10, %c0_11] : memref<1x128xf32, #tpu.memory_space<vmem>>, vector<1x128xf32>
      tpu.vector_store %arg3[%c0_10, %c0_11], %21 {strides = array<i32>} : memref<1x128xf32, #tpu.memory_space<vmem>>, vector<1x128xf32>,
    } else {
    }
    return
  }
  func.func @transform_0(%arg0: i32) -> (i32, i32) {
    %c0_i32 = arith.constant 0 : i32
    %c0_i32_0 = arith.constant 0 : i32
    return %c0_i32, %arg0 : i32, i32
  }
  func.func @transform_1(%arg0: i32) -> (i32, i32) {
    %c0_i32 = arith.constant 0 : i32
    %c0_i32_0 = arith.constant 0 : i32
    return %c0_i32, %arg0 : i32, i32
  }
  func.func @transform_2(%arg0: i32) -> (i32, i32) {
    %c0_i32 = arith.constant 0 : i32
    %c0_i32_0 = arith.constant 0 : i32
    return %c0_i32, %arg0 : i32, i32
  }
}

</mosaic_0001>

<bundles_post_ra>
// kernel: tpu_custom_call.1
= control target key start
LH: loop header
LB: loop body
LE: loop exit
PB: predicated region body
PF: predicated region fallthrough
CT: control target
= control target key end

     0   :  { %7 = vsyncpa [#allocation3], 0  ;;  %s245_s0 = inlined_call_operand.hbm [shape: f32[27,50], index: 0, kind: input, shape index: {}]   ;;  %s246_s1 = inlined_call_operand.vmem [shape: s32[1,50], index: 1, kind: input, shape index: {}]   ;;  %s247_s2 = inlined_call_operand.hbm [shape: f32[1,128], index: 2, kind: output, shape index: {}]  }
   0x1   :  { %8 = vsyncpa [#allocation4], 0  ;;  %s195_s9 = smov [#allocation2]   ;;  %s147_s13 = scalar_lea.hbm %s245_s0, 512 }
   0x2   :  { %s14_s10 = sshll.u32 %s195_s9, 4  ;;  %p148_p0 = scmp.ne.s32.totalorder %s245_s0, %s147_s13  ;;  %s15_s10 = int_to_ptr.vmem [resolvable:$true] %s14_s10 }
   0x3   :  { %p151_p1 = scmp.lt.u32.totalorder %s147_s13, %s245_s0 }
   0x5   :  { %p153_p2 = pnand %p151_p1, %p148_p0 }
   0x7   :  { %156 = shalt.err (!%p153_p2)
}
   0x8   :  { %s157_s18 = scalar_lea.vmem %s15_s10, 512  ;;  %p162_p4 = scmp.lt.s32.totalorder %s15_s10, %s15_s10 }
   0x9   :  { %p158_p3 = scmp.ne.s32.totalorder %s15_s10, %s157_s18  ;;  %p163_p5 = scmp.lt.s32.totalorder %s157_s18, %s157_s18 }
   0xb   :  { %p164_p6 = por %p163_p5, %p162_p4 }
   0xd   :  { %p165_p7 = pnand %p164_p6, %p158_p3 }
   0xf   :  { %168 = shalt.err (!%p165_p7)
}
  0x10   :  { %s196_s19 = smov 128   ;;  %s197_s20 = smov 8  }
  0x11   :  { %20 = dma.hbm_to_vmem [thread:$0]  %s245_s0, 512, %s15_s10, [#allocation3], %s196_s19, %s196_s19, %s197_s20  }
  0x12   :  { %191 = dma.done.wait [#allocation3], 512  }
  0x13   :  { %192 = vsyncadd [#allocation3], 4294966784  ;;  %vm31_vm0 = vcmask 1042432   ;;  %v26_v0 = vld [vmem:[#allocation2] sm:$0xff]  ;;  %v27_v1 = vld [vmem:[#allocation2 + $0x8] sm:$0xff]  ;;  %v66_v10 = vlaneseq }
  0x14   :  { %v28_v2 = vld [vmem:[#allocation2 + $0x10] sm:$0xff]  ;;  %v29_v3 = vld [vmem:[#allocation2 + $0x18] sm:$0x7]  ;;  %v33_v4 = vmax.f32 %v26_v0, %v27_v1  ;;  %v131_v17 = vld [vmem:[%s246_s1] ss:$0 sm:$0xff]  ;;  %s199_s1 = smov [#allocation5]  }
  0x15   :  { %v32_v5 = vsel %vm31_vm0, %v29_v3, -inf  ;;  %v67_v13 = vshrl.u32 %v66_v10, 7  ;;  %v198_v28 = vmov 0.0038461538   ;;  %v104_v61 = vand.u32 127, %v66_v10  ;;  %s122_s24 = sshll.u32 %s199_s1, 4  ;;  %s123_s24 = int_to_ptr.vmem [resolvable:$true] %s122_s24 }
  0x16   :  { %v34_v6 = vmax.f32 %v28_v2, %v32_v5  ;;  %s169_s25 = scalar_lea.vmem %s123_s24, 16  ;;  %s173_s26 = scalar_lea.vmem %s123_s24, 32 }
  0x17   :  { %v68_v16 = vadd.s32 8, %v67_v13  ;;  %v69_v26 = vadd.s32 16, %v67_v13  ;;  %vm75_vm1 = vcmp.eq.s32.totalorder %v67_v13, %v131_v17  ;;  %v70_v27 = vadd.s32 24, %v67_v13  ;;  %p170_p8 = scmp.ne.s32.totalorder %s123_s24, %s169_s25  ;;  %p174_p9 = scmp.lt.s32.totalorder %s123_s24, %s123_s24 }
  0x18   :  { %v35_v7 = vmax.f32 %v33_v4, %v34_v6  ;;  %v79_v29 = vsel %vm75_vm1, 0.9, %v198_v28  ;;  %vm108_vm5 = vcmp.lt.s32.totalorder %v104_v61, 50  ;;  %p175_p10 = scmp.lt.s32.totalorder %s173_s26, %s169_s25 }
  0x19   :  { %vm76_vm2 = vcmp.eq.s32.totalorder %v68_v16, %v131_v17  ;;  %vm77_vm3 = vcmp.eq.s32.totalorder %v69_v26, %v131_v17  ;;  %vm78_vm4 = vcmp.eq.s32.totalorder %v70_v27, %v131_v17  ;;  %v83_v31 = vmul.f32 %v79_v29, %v26_v0 }
  0x1a   :  { %v36_v8 = vrot.slane %v35_v7, 4  ;;  %v80_v30 = vsel %vm76_vm2, 0.9, %v198_v28  ;;  %v81_v33 = vsel %vm77_vm3, 0.9, %v198_v28  ;;  %p176_p11 = por %p175_p10, %p174_p9 }
  0x1b   :  { %v84_v32 = vmul.f32 %v80_v30, %v27_v1  ;;  %v82_v34 = vsel %vm78_vm4, 0.9, %v198_v28  ;;  %v85_v35 = vmul.f32 %v81_v33, %v28_v2 }
  0x1c   :  { %v37_v9 = vmax.f32 %v35_v7, %v36_v8  ;;  %v86_v38 = vmul.f32 %v82_v34, %v29_v3  ;;  %p177_p12 = pnand %p176_p11, %p170_p8 }
  0x1d   :  { %v87_v36 = vadd.f32 %v84_v32, %v83_v31 }
  0x1e   :  { %v38_v11 = vrot.slane %v37_v9, 2  ;;  %v89_v46 = vsel %vm31_vm0, %v86_v38, 0.0 }
  0x1f   :  { %v88_v43 = vadd.f32 %v87_v36, %v85_v35 }
  0x20   :  { %v39_v12 = vmax.f32 %v37_v9, %v38_v11 }
  0x21   :  { %v90_v48 = vadd.f32 %v89_v46, %v88_v43 }
  0x22   :  { %v40_v14 = vrot.slane %v39_v12, 1 }
  0x23   :  { %v91_v51 = vrot.slane %v90_v48, 4 }
  0x24   :  { %v41_v15 = vmax.f32 %v39_v12, %v40_v14 }
  0x25   :  { %v92_v54 = vadd.f32 %v91_v51, %v90_v48 }
  0x26   :  { %v42_v18 = vsub.f32 %v26_v0, %v41_v15  ;;  %v43_v19 = vsub.f32 %v27_v1, %v41_v15  ;;  %v44_v20 = vsub.f32 %v28_v2, %v41_v15  ;;  %v45_v21 = vsub.f32 %v29_v3, %v41_v15 }
  0x27   :  { %v93_v57 = vrot.slane %v92_v54, 2 }
  0x28   :  { %v46_v22 = vmul.f32 1.442695, %v42_v18  ;;  %v48_v23 = vmul.f32 1.442695, %v43_v19  ;;  %v50_v24 = vmul.f32 1.442695, %v44_v20 }
  0x29   :  { %v52_v25 = vmul.f32 1.442695, %v45_v21  ;;  %v94_v58 = vadd.f32 %v93_v57, %v92_v54 }
  0x2a   :  { %137 = vpow2.f32 %v46_v22 }
  0x2b   :  { %139 = vpow2.f32 %v48_v23  ;;  %v95_v59 = vrot.slane %v94_v58, 1 }
  0x2c   :  { %141 = vpow2.f32 %v50_v24 }
  0x2d   :  { %143 = vpow2.f32 %v52_v25  ;;  %v96_v63 = vadd.f32 %v95_v59, %v94_v58 }
  0x34   :  { %v138_v37 = vpop.eup %137 }
  0x35   :  { %v140_v39 = vpop.eup %139 }
  0x36   :  { %v142_v40 = vpop.eup %141  ;;  %v54_v41 = vadd.f32 %v140_v39, %v138_v37 }
  0x37   :  { %v144_v42 = vpop.eup %143 }
  0x38   :  { %v55_v44 = vadd.f32 %v142_v40, %v54_v41  ;;  %v56_v45 = vsel %vm31_vm0, %v144_v42, 0.0 }
  0x3a   :  { %v57_v47 = vadd.f32 %v56_v45, %v55_v44 }
  0x3c   :  { %v58_v49 = vrot.slane %v57_v47, 4 }
  0x3e   :  { %v59_v50 = vadd.f32 %v58_v49, %v57_v47 }
  0x40   :  { %v60_v52 = vrot.slane %v59_v50, 2 }
  0x42   :  { %v61_v53 = vadd.f32 %v60_v52, %v59_v50 }
  0x44   :  { %v62_v55 = vrot.slane %v61_v53, 1 }
  0x46   :  { %v63_v56 = vadd.f32 %v62_v55, %v61_v53 }
  0x48   :  { %145 = vlog2.f32 %v63_v56 }
  0x52   :  { %v146_v60 = vpop.eup %145 }
  0x53   :  { %v65_v62 = vmul.f32 0.6931472, %v146_v60 }
  0x55   :  { %v97_v0 = vadd.f32 %v65_v62, %v41_v15 }
  0x57   :  { %v98_v1 = vsub.f32 %v97_v0, %v96_v63 }
  0x59   :  { %v109_v2 = vsel %vm108_vm5, %v98_v1, 0.0 }
  0x5a   :  { %110 = vst [vmem:[#allocation5] sm:$0x1] %v109_v2 }
  0x5b   :  { %180 = shalt.err (!%p177_p12)
}
  0x5c   :  { %s181_s29 = scalar_lea.hbm %s247_s2, 16 }
  0x5d   :  { %p182_p13 = scmp.ne.s32.totalorder %s247_s2, %s181_s29  ;;  %p185_p0 = scmp.lt.u32.totalorder %s181_s29, %s247_s2 }
  0x5f   :  { %p187_p1 = pnand %p185_p0, %p182_p13 }
  0x61   :  { %190 = shalt.err (!%p187_p1)
}
  0x62   :  { %125 = dma.vmem_to_hbm [thread:$0]  %s123_s24, 16, %s247_s2, [#allocation4]  }
  0x63   :  { %193 = dma.done.wait [#allocation4], 16  }
  0x64   :  { %194 = vsyncadd [#allocation4], 4294967280 }
  0x65   :  { %129 = vsyncpa [#allocation3], 1 }
  0x66   :  { %130 = vsyncpa [#allocation4], 1 }

</bundles_post_ra>
